<compile_context>
chip_gen: v6e
topology: v6e:2x2x1
jax: 0.10.0
libtpu: 0.0.40
codegen_flags: <defaults>
</compile_context>

<pallas_src>
import jax
import jax.numpy as jnp
from jax import lax
from jax.experimental import pallas as pl
from jax.experimental.pallas import tpu as pltpu

# SELU constants (match torch.nn.functional.selu)
_SELU_ALPHA = 1.6732632423543772848170429916717
_SELU_SCALE = 1.0507009873554804934193349852946
_SELU_SCALE_ALPHA = _SELU_SCALE * _SELU_ALPHA

_LANE_WIDTH = 512        # lane-dense last dim (multiple of 128) -> unmasked vld/vst
_MAX_BLOCK_ROWS = 2048   # 2048 x 512 x 4B = 4 MiB per block (16 MiB double-buffered in+out)
_TARGET_GRID = 8         # aim for >= 8 grid steps so v7x megacore + pipelining engage
_MIN_PALLAS_F32 = 4 * _LANE_WIDTH  # below this (8 KiB) plain fused XLA is faster


def _selu(x):
    # scale * x                       if x > 0
    # scale * alpha * (exp(x) - 1)    otherwise   (constants pre-folded)
    # min(x, 0) keeps the unselected branch finite (no inf -> no NaN grads) and
    # is cheaper than the old abs + Taylor guard; exp(x)-1 error (~1e-7 abs near
    # zero in f32) is well inside tolerance for this HBM-bound op.
    neg = _SELU_SCALE_ALPHA * (jnp.exp(jnp.minimum(x, 0.0)) - 1.0)
    return jnp.where(x > 0, _SELU_SCALE * x, neg)


def _selu_kernel(x_ref, o_ref):
    o_ref[...] = _selu(x_ref[...])


def _round_up(n, m):
    return ((n + m - 1) // m) * m


def _complex_to_f32_flat(x):
    """complex64[...] -> flat f32 [re0, im0, re1, im1, ...]; zero-copy when possible."""
    try:
        f = lax.bitcast_convert_type(x, jnp.float32)          # (..., 2), free view
    except Exception:
        # TODO(synk): lax.bitcast_convert_type rejects complex dtypes in this JAX
        # version; this fallback costs one fused HBM pass (read c64, write f32).
        f = jnp.stack((jnp.real(x), jnp.imag(x)), axis=-1)
    return f.reshape(-1)


def _f32_flat_to_complex(flat, shape):
    f = flat.reshape(*shape, 2)
    try:
        return lax.bitcast_convert_type(f, jnp.complex64)     # free view
    except Exception:
        return lax.complex(f[..., 0], f[..., 1])              # one fused pass


@jax.jit
def complex_selu(x):
    """Apply SELU independently to real/imag parts of a complex array (any shape)."""
    orig_shape = x.shape
    total_f32 = 2 * x.size

    # Tiny inputs or complex128: skip Pallas, keep dtype exactly.
    if x.dtype != jnp.complex64 or total_f32 < _MIN_PALLAS_F32:
        return lax.complex(jax.nn.selu(jnp.real(x)), jax.nn.selu(jnp.imag(x)))

    flat = _complex_to_f32_flat(x)

    # Pad only to sublane/lane granularity (< 16 KiB), never to a whole block.
    rows_min = pl.cdiv(total_f32, _LANE_WIDTH)
    rows = _round_up(rows_min, 8)
    padded_len = rows * _LANE_WIDTH
    if padded_len != total_f32:
        flat = jnp.pad(flat, (0, padded_len - total_f32))
    slab = flat.reshape(rows, _LANE_WIDTH)

    # Block rows: big enough to amortize per-step overhead, small enough to give
    # >= ~_TARGET_GRID steps for megacore sharding / DMA-compute overlap.
    block_rows = _round_up(pl.cdiv(rows, _TARGET_GRID), 8)
    block_rows = max(8, min(_MAX_BLOCK_ROWS, block_rows))
    grid = (pl.cdiv(rows, block_rows),)   # partial tail block allowed

    spec = pl.BlockSpec((block_rows, _LANE_WIDTH), lambda i: (i, 0))

    out = pl.pallas_call(
        _selu_kernel,
        out_shape=jax.ShapeDtypeStruct((rows, _LANE_WIDTH), jnp.float32),
        grid_spec=pltpu.PrefetchScalarGridSpec(
            num_scalar_prefetch=0,
            grid=grid,
            in_specs=[spec],
            out_specs=spec,
        ),
        compiler_params=pltpu.CompilerParams(
            dimension_semantics=("parallel",),     # shards rows across TCs on v7x
            vmem_limit_bytes=32 * 1024 * 1024,     # 16 MiB double-buffered footprint + slack
        ),
    )(slab)

    out_flat = out.reshape(-1)[:total_f32]
    return _f32_flat_to_complex(out_flat, orig_shape)


def _reference_complex_selu(x):
    # Independent reference: jax.nn.selu matches torch.nn.functional.selu.
    return lax.complex(jax.nn.selu(jnp.real(x)), jax.nn.selu(jnp.imag(x)))


if __name__ == "__main__":
    key = jax.random.PRNGKey(0)
    k_re, k_im = jax.random.split(key)
    # NCHW complex input, e.g. output of an FFT in the FFNO block.
    N, C, H, W = 2, 4, 32, 32
    re = jax.random.normal(k_re, (N, C, H, W), dtype=jnp.float32)
    im = jax.random.normal(k_im, (N, C, H, W), dtype=jnp.float32)
    x = lax.complex(re, im)

    out = complex_selu(x)
    out = jax.block_until_ready(out)

    ref = _reference_complex_selu(x)
    assert out.shape == x.shape and out.dtype == x.dtype
    assert jnp.allclose(jnp.real(out), jnp.real(ref), atol=1e-5, rtol=1e-5)
    assert jnp.allclose(jnp.imag(out), jnp.imag(ref), atol=1e-5, rtol=1e-5)

    print("KERNEL_OK")
</pallas_src>

<mosaic_0001>
module attributes {stable_mosaic.version = 11 : i64} {
  func.func @_selu_kernel(%arg0: i32, %arg1: memref<8x512xf32, #tpu.memory_space<vmem>>, %arg2: memref<8x512xf32, #tpu.memory_space<vmem>>) attributes {dimension_semantics = [#tpu.dimension_semantics<parallel>], iteration_bounds = array<i64: 4>, scalar_prefetch = 0 : i64, scratch_operands = 0 : i64, tpu.core_type = #tpu.core_type<tc>, window_params = [{transform_indices = @transform_0, window_bounds = array<i64: 8, 512>}, {transform_indices = @transform_1, window_bounds = array<i64: 8, 512>}]} {
    %c0 = arith.constant 0 : index
    %c0_0 = arith.constant 0 : index
    %0 = vector.load %arg1[%c0, %c0_0] : memref<8x512xf32, #tpu.memory_space<vmem>>, vector<8x512xf32>
    %cst = arith.constant 0.000000e+00 : f32
    %1 = vector.broadcast %cst : f32 to vector<8x512xf32>
    %2 = arith.minimumf %0, %1 : vector<8x512xf32>
    %3 = math.exp %2 : vector<8x512xf32>
    %cst_1 = arith.constant 1.000000e+00 : f32
    %4 = vector.broadcast %cst_1 : f32 to vector<8x512xf32>
    %5 = arith.subf %3, %4 : vector<8x512xf32>
    %cst_2 = arith.constant 1.75809932 : f32
    %6 = vector.broadcast %cst_2 : f32 to vector<8x512xf32>
    %7 = arith.mulf %6, %5 : vector<8x512xf32>
    %cst_3 = arith.constant 0.000000e+00 : f32
    %8 = vector.broadcast %cst_3 : f32 to vector<8x512xf32>
    %9 = arith.cmpf ogt, %0, %8 : vector<8x512xf32>
    %cst_4 = arith.constant 1.05070102 : f32
    %10 = vector.broadcast %cst_4 : f32 to vector<8x512xf32>
    %11 = arith.mulf %10, %0 : vector<8x512xf32>
    %12 = arith.select %9, %11, %7 : vector<8x512xi1>, vector<8x512xf32>
    %c0_5 = arith.constant 0 : index
    %c0_6 = arith.constant 0 : index
    %13 = vector.load %arg2[%c0_5, %c0_6] : memref<8x512xf32, #tpu.memory_space<vmem>>, vector<8x512xf32>
    tpu.vector_store %arg2[%c0_5, %c0_6], %12 {strides = array<i32>} : memref<8x512xf32, #tpu.memory_space<vmem>>, vector<8x512xf32>,
    return
  }
  func.func @transform_0(%arg0: i32) -> (i32, i32) {
    %c0_i32 = arith.constant 0 : i32
    %c0_i32_0 = arith.constant 0 : i32
    return %arg0, %c0_i32 : i32, i32
  }
  func.func @transform_1(%arg0: i32) -> (i32, i32) {
    %c0_i32 = arith.constant 0 : i32
    %c0_i32_0 = arith.constant 0 : i32
    return %arg0, %c0_i32 : i32, i32
  }
}

</mosaic_0001>

<bundles_post_ra>
// kernel: custom-call
= control target key start
LH: loop header
LB: loop body
LE: loop exit
PB: predicated region body
PF: predicated region fallthrough
CT: control target
= control target key end

     0   :  { %2 = vsyncpa [#allocation0], 0  ;;  %s47_s0 = inlined_call_operand.hbm [shape: c64[2,4,32,32], index: 0, kind: input, shape index: {}]   ;;  %s48_s1 = inlined_call_operand.vmem [shape: f32[2,4,32,32], index: 1, kind: output, shape index: {}]  }
   0x1   :  { %s3_s8 = sshll.u32 %s48_s1, 4  ;;  %s4_s8 = int_to_ptr.vmem [resolvable:$true] %s3_s8 }
   0x2   :  { %s17_s9 = scalar_lea.vmem %s4_s8, 4096  ;;  %p22_p1 = scmp.lt.s32.totalorder %s4_s8, %s4_s8 }
   0x3   :  { %p18_p0 = scmp.ne.s32.totalorder %s4_s8, %s17_s9  ;;  %p23_p2 = scmp.lt.s32.totalorder %s17_s9, %s17_s9 }
   0x5   :  { %p24_p3 = por %p23_p2, %p22_p1 }
   0x7   :  { %p25_p4 = pnand %p24_p3, %p18_p0 }
   0x9   :  { %28 = shalt.err (!%p25_p4)  }
   0xa   :  { %6 = dma.hbm_to_vmem [thread:$0]  %s47_s0, 4096, %s4_s8, [#allocation0] }
   0xb   :  { %29 = dma.done.wait [#allocation0], 4096  }
   0xc   :  { %30 = vsyncadd [#allocation0], 4294963200 }
   0xd   :  { %8 = vsyncpa [#allocation0], 1 }

// kernel: custom-call.1
= control target key start
LH: loop header
LB: loop body
LE: loop exit
PB: predicated region body
PF: predicated region fallthrough
CT: control target
= control target key end

     0   :  { %s51_s0 = inlined_call_operand.hbm [shape: c64[2,4,32,32], index: 0, kind: input, shape index: {}]   ;;  %s52_s1 = inlined_call_operand.vmem [shape: f32[2,4,32,32], index: 1, kind: output, shape index: {}]  }
   0x1   :  { %s2_s8 = scalar_lea.hbm %s51_s0, 4096 }
   0x2   :  { %3 = vsyncpa [#allocation0], 0  ;;  %s4_s11 = sshll.u32 %s52_s1, 4  ;;  %s5_s11 = int_to_ptr.vmem [resolvable:$true] %s4_s11 }
   0x3   :  { %s20_s12 = scalar_lea.vmem %s5_s11, 4096  ;;  %p25_p1 = scmp.lt.s32.totalorder %s5_s11, %s5_s11 }
   0x4   :  { %p21_p0 = scmp.ne.s32.totalorder %s5_s11, %s20_s12  ;;  %p26_p2 = scmp.lt.s32.totalorder %s20_s12, %s20_s12 }
   0x6   :  { %p27_p3 = por %p26_p2, %p25_p1 }
   0x8   :  { %p28_p4 = pnand %p27_p3, %p21_p0 }
   0xa   :  { %31 = shalt.err (!%p28_p4)  }
   0xb   :  { %7 = dma.hbm_to_vmem [thread:$0]  %s2_s8, 4096, %s5_s11, [#allocation0] }
   0xc   :  { %33 = dma.done.wait [#allocation0], 4096  }
   0xd   :  { %34 = vsyncadd [#allocation0], 4294963200 }
   0xe   :  { %9 = vsyncpa [#allocation0], 1 }

// kernel: complex_selu.1
= control target key start
LH: loop header
LB: loop body
LE: loop exit
PB: predicated region body
PF: predicated region fallthrough
CT: control target
= control target key end

     0   :  { %s263_s6 = smov 0   ;;  %s283_s0 = inlined_call_operand.vmem [shape: f32[32,512], index: 0, kind: input, shape index: {}]   ;;  %s284_s1 = inlined_call_operand.vmem [shape: f32[32,512], index: 1, kind: output, shape index: {}]  }
   0x1 LB: > { %s212_s7 = sadd.s32 4294967295, %s251_s6   ;;  %p216_p0 = scmp.ge.s32.totalorder %s251_s6, 1  ;;  %s251_s6 = sphi %s263_s6, %s11_s6  }
   0x2   : > { %p87_p1 = scmp.lt.s32.totalorder %s251_s6, 5 }
   0x4   : > { %p88_p2 = pnand %p216_p0, %p87_p1 }
   0x5   : > { %p107_p3 = scmp.lt.s32.totalorder (!%p88_p2), %s212_s7, 3 }
   0x6   : > { %91 = sbr.rel (%p88_p2) target bundleno = 42 (0x2a), region = 24 }
   0xb   : > { %s286_s7 = smov (!%p107_p3, %s212_s7), 3 }
   0xc   : > { %s227_s8 = sshll.u32 %s286_s7, 5 }
   0xd   : > { %s111_s11 = scalar_lea.vmem %s283_s0, %s227_s8  ;;  %s116_s14 = scalar_lea.vmem %s284_s1, %s227_s8 }
   0xe   : > { %v117_v0 = vld [vmem:[%s111_s11] sm:$0xff]  ;;  %v118_v1 = vld [vmem:[%s111_s11 + $0x8] sm:$0xff]  ;;  %v119_v2 = vld [vmem:[%s111_s11 + $0x10] sm:$0xff] }
   0xf   : > { %v121_v3 = vmin.f32 %v117_v0, 0.0  ;;  %v122_v4 = vmin.f32 %v118_v1, 0.0  ;;  %v120_v5 = vld [vmem:[%s111_s11 + $0x18] sm:$0xff]  ;;  %v123_v6 = vmin.f32 %v119_v2, 0.0  ;;  %v145_v15 = vmul.f32 1.050701, %v117_v0 }
  0x10   : > { %v124_v10 = vmin.f32 %v120_v5, 0.0  ;;  %vm141_vm0 = vcmp.gt.f32.partialorder %v117_v0, 0.0  ;;  %v146_v18 = vmul.f32 1.050701, %v118_v1  ;;  %vm142_vm1 = vcmp.gt.f32.partialorder %v118_v1, 0.0 }
  0x11   : > { %v125_v7 = vmul.f32 1.442695, %v121_v3  ;;  %v127_v8 = vmul.f32 1.442695, %v122_v4  ;;  %v129_v9 = vmul.f32 1.442695, %v123_v6 }
  0x12   : > { %v131_v11 = vmul.f32 1.442695, %v124_v10  ;;  %v147_v22 = vmul.f32 1.050701, %v119_v2  ;;  %vm143_vm2 = vcmp.gt.f32.partialorder %v119_v2, 0.0  ;;  %vm144_vm3 = vcmp.gt.f32.partialorder %v120_v5, 0.0 }
  0x13   : > { %237 = vpow2.f32 %v125_v7  ;;  %v148_v25 = vmul.f32 1.050701, %v120_v5 }
  0x14   : > { %239 = vpow2.f32 %v127_v8 }
  0x15   : > { %241 = vpow2.f32 %v129_v9 }
  0x16   : > { %243 = vpow2.f32 %v131_v11 }
  0x20   : > { %v238_v12 = vpop.eup %237 }
  0x21   : > { %v240_v13 = vpop.eup %239  ;;  %v221_v14 = vadd.f32 -1.0, %v238_v12 }
  0x22   : > { %v242_v16 = vpop.eup %241  ;;  %v222_v17 = vadd.f32 -1.0, %v240_v13 }
  0x23   : > { %v244_v19 = vpop.eup %243  ;;  %v137_v20 = vmul.f32 1.7580993, %v221_v14  ;;  %v223_v21 = vadd.f32 -1.0, %v242_v16 }
  0x24   : > { %v138_v23 = vmul.f32 1.7580993, %v222_v17  ;;  %v224_v24 = vadd.f32 -1.0, %v244_v19 }
  0x25   : > { %v149_v26 = vsel %vm141_vm0, %v145_v15, %v137_v20  ;;  %v139_v27 = vmul.f32 1.7580993, %v223_v21 }
  0x26   : > { %153 = vst [vmem:[%s116_s14] sm:$0xff] %v149_v26  ;;  %v150_v28 = vsel %vm142_vm1, %v146_v18, %v138_v23  ;;  %v140_v29 = vmul.f32 1.7580993, %v224_v24 }
  0x27   : > { %154 = vst [vmem:[%s116_s14 + $0x8] sm:$0xff] %v150_v28  ;;  %v151_v30 = vsel %vm143_vm2, %v147_v22, %v139_v27 }
  0x28   : > { %155 = vst [vmem:[%s116_s14 + $0x10] sm:$0xff] %v151_v30  ;;  %v152_v31 = vsel %vm144_vm3, %v148_v25, %v140_v29 }
  0x29   : > { %156 = vst [vmem:[%s116_s14 + $0x18] sm:$0xff] %v152_v31 }
  0x2a PF: > { %s11_s6 = sadd.s32 1, %s251_s6  }
  0x2b   : > { %p8_p4 = scmp.ge.s32.totalorder %s11_s6, 6  }
  0x2d   :  { %10 = sbr.rel (!%p8_p4) target bundleno = 1 (0x1), region = 54 }

// kernel: custom-call.2
= control target key start
LH: loop header
LB: loop body
LE: loop exit
PB: predicated region body
PF: predicated region fallthrough
CT: control target
= control target key end

     0   :  { %s92_s0 = inlined_call_operand.vmem [shape: f32[2,4,32,32], index: 0, kind: input, shape index: {}]   ;;  %s93_s1 = inlined_call_operand.vmem [shape: f32[2,4,32,32], index: 1, kind: input, shape index: {}]   ;;  %s94_s2 = inlined_call_operand.hbm [shape: c64[2,4,32,32], index: 2, kind: output, shape index: {}]  }
   0x1   :  { %s3_s11 = scalar_lea.hbm %s94_s2, 4096 }
   0x2   :  { %4 = vsyncpa [#allocation0], 0  ;;  %s5_s14 = sshll.u32 %s92_s0, 4  ;;  %s6_s14 = int_to_ptr.vmem [resolvable:$true] %s5_s14 }
   0x3   :  { %s18_s15 = scalar_lea.vmem %s6_s14, 4096  ;;  %p23_p1 = scmp.lt.s32.totalorder %s6_s14, %s6_s14 }
   0x4   :  { %p19_p0 = scmp.ne.s32.totalorder %s6_s14, %s18_s15  ;;  %p24_p2 = scmp.lt.s32.totalorder %s18_s15, %s18_s15 }
   0x6   :  { %p25_p3 = por %p24_p2, %p23_p1 }
   0x8   :  { %p26_p4 = pnand %p25_p3, %p19_p0 }
   0xa   :  { %29 = shalt.err (!%p26_p4)  }
   0xb   :  { %8 = dma.vmem_to_hbm [thread:$0]  %s6_s14, 4096, %s94_s2, [#allocation0] }
   0xc   :  { %61 = dma.done.wait [#allocation0], 4096  }
   0xd   :  { %62 = vsyncadd [#allocation0], 4294963200 }
   0xe   :  { %10 = vsyncpa [#allocation0], 1 }
   0xf   :  { %11 = vsyncpa [#allocation1], 0  ;;  %s12_s0 = sshll.u32 %s93_s1, 4  ;;  %s13_s0 = int_to_ptr.vmem [resolvable:$true] %s12_s0 }
  0x10   :  { %s38_s20 = scalar_lea.vmem %s13_s0, 4096  ;;  %p43_p6 = scmp.lt.s32.totalorder %s13_s0, %s13_s0 }
  0x11   :  { %p39_p5 = scmp.ne.s32.totalorder %s13_s0, %s38_s20  ;;  %p44_p7 = scmp.lt.s32.totalorder %s38_s20, %s38_s20 }
  0x13   :  { %p45_p8 = por %p44_p7, %p43_p6 }
  0x15   :  { %p46_p9 = pnand %p45_p8, %p39_p5 }
  0x17   :  { %49 = shalt.err (!%p46_p9)  }
  0x18   :  { %15 = dma.vmem_to_hbm [thread:$0]  %s13_s0, 4096, %s3_s11, [#allocation1] }
  0x19   :  { %63 = dma.done.wait [#allocation1], 4096  }
  0x1a   :  { %64 = vsyncadd [#allocation1], 4294963200 }
  0x1b   :  { %17 = vsyncpa [#allocation1], 1 }

</bundles_post_ra>
